<compile_context>
chip_gen: v6e
topology: v6e:2x2x1
jax: 0.10.0
libtpu: 0.0.40
codegen_flags: <defaults>
</compile_context>

<pallas_src>
import functools

import jax
import jax.numpy as jnp
import numpy as np
from jax.experimental import pallas as pl
from jax.experimental.pallas import tpu as pltpu

NEG_SLOPE = 0.01   # nn.LeakyReLU default
BN_EPS = 1e-5      # nn.BatchNorm2d default


def _leaky(x):
    return jnp.where(x > 0, x, NEG_SLOPE * x)


def _dcr_kernel(x_ref, mask_ref, wa_ref, w2_ref, out_ref, *, width, cout):
    """One batch-group per grid step.  All activations are (C, lanes), lanes = spb*H*W.

    x_ref    : (Cin, lanes)             input group (spb samples folded into lanes)
    mask_ref : (9, lanes)               per-tap validity mask (zero padding + sample
                                        boundaries), tiled per sample
    wa_ref   : (2*Cout, 9*Cin + 1)      [conv1 (BN1-scaled) ; 1x1 shortcut (BNs-scaled,
                                        embedded in centre-tap columns)]; last column
                                        is the folded bias/BN shift
    w2_ref   : (Cout, 9*Cout + 1)       conv2 weights (BN2-scaled) + bias column
    out_ref  : (Cout, lanes)
    """
    lanes = x_ref.shape[-1]
    x = x_ref[...]                                           # (Cin, lanes)
    mask = mask_ref[...]                                     # (9, lanes)
    ones = jnp.ones((1, lanes), jnp.float32)                 # bias row for the matmuls

    def im2col(act):
        # Build (9*C + 1, lanes) columns entirely in vregs.
        # taps[k][c, q] = act[c, q + sh*W + sw] if the (h+sh, w+sw) tap is in-bounds
        # (same sample) else 0.  Rolls wrap over the whole lane axis, but every wrapped
        # or cross-sample read is an out-of-bounds tap and is zeroed by the mask.
        taps = []
        for k in range(9):
            sh, sw = k // 3 - 1, k % 3 - 1
            s = sh * width + sw
            if s == 0:
                taps.append(act)                             # centre tap: no shift/mask
            else:
                v = pltpu.roll(act, (-s) % lanes, 1)         # v[q] = act[(q+s) % lanes]
                taps.append(v * mask[k:k + 1, :])
        taps.append(ones)                                    # folded bias row
        return jnp.concatenate(taps, axis=0)

    # ---- conv1 (3x3, pad=1) + BN1 + LeakyReLU, fused with the 1x1 shortcut ----
    za = _leaky(jnp.dot(wa_ref[...], im2col(x),
                        preferred_element_type=jnp.float32))  # (2*Cout, lanes)
    y1 = za[:cout]                                            # conv1 branch
    res = za[cout:]                                           # shortcut branch

    # ---- conv2 (3x3, pad=1) + BN2 + LeakyReLU ----
    y2 = _leaky(jnp.dot(w2_ref[...], im2col(y1),
                        preferred_element_type=jnp.float32))  # (Cout, lanes)

    out_ref[...] = (y2 + res).astype(out_ref.dtype)


def _fold_bn(conv_bias, gamma, beta, mean, var):
    """Return (scale, shift) s.t. BN(conv(x) + b) == scale * conv(x) + shift."""
    scale = gamma / jnp.sqrt(var + BN_EPS)
    shift = (conv_bias - mean) * scale + beta
    return scale.astype(jnp.float32), shift.astype(jnp.float32)


def _tap_masks(h, w):
    hh = np.arange(h)[:, None]
    ww = np.arange(w)[None, :]
    rows = []
    for k in range(9):
        sh, sw = k // 3 - 1, k % 3 - 1
        m = ((hh + sh >= 0) & (hh + sh < h) & (ww + sw >= 0) & (ww + sw < w))
        rows.append(m.reshape(-1))
    return np.stack(rows).astype(np.float32)                 # (9, H*W)


def _pick_samples_per_block(n, hw, lane_lo=512, lane_hi=4096):
    """How many batch samples to fold into the lane axis of one grid step.

    Prefers >= lane_lo lanes per matmul (MXU/DMA efficiency, ~85% HBM roofline per
    measured tiling data).  With larger batches this naturally leaves >= 2 parallel
    grid steps so both v7x TensorCores get work; lane_hi bounds per-step VMEM so the
    same configuration stays safe on v7x's 64 MiB VMEM.
    """
    divisors = [d for d in range(1, n + 1) if n % d == 0]
    spb = next((d for d in divisors if d * hw >= lane_lo), divisors[-1])
    while spb > 1 and spb * hw > lane_hi:
        spb = max(d for d in divisors if d < spb)
    return spb


def double_conv3x3_residual(x_nchw, p):
    """x_nchw: (N, Cin, H, W) float32 -> (N, Cout, H, W) float32 (eval-mode BN)."""
    x_nchw = x_nchw.astype(jnp.float32)
    N, Cin, H, W = x_nchw.shape
    Cout = p["w1_t"].shape[0]
    HW = H * W

    spb = _pick_samples_per_block(N, HW)                     # samples folded per step
    G = N // spb                                             # grid steps
    lanes = spb * HW

    # NCHW -> channel-major with the batch folded into the lane axis: (Cin, N*HW)
    x = jnp.transpose(x_nchw.reshape(N, Cin, HW), (1, 0, 2)).reshape(Cin, N * HW)

    s1, b1 = _fold_bn(p["b1"], p["g1"], p["be1"], p["m1"], p["v1"])
    s2, b2 = _fold_bn(p["b2"], p["g2"], p["be2"], p["m2"], p["v2"])
    ss, bs = _fold_bn(p["bs"], p["gs"], p["bes"], p["ms"], p["vs"])

    # torch OIHW -> (Cout, 9*C) with K ordered (tap, channel); BN scale folded in.
    # NOTE: operands stay f32 here; bf16 casting (MXU-native) only pays off at
    # production channel counts and would loosen the 1e-4 check.
    w1 = jnp.transpose(p["w1_t"], (0, 2, 3, 1)).reshape(Cout, 9 * Cin) * s1[:, None]
    w2 = jnp.transpose(p["w2_t"], (0, 2, 3, 1)).reshape(Cout, 9 * Cout) * s2[:, None]
    ws = p["ws_t"][:, :, 0, 0] * ss[:, None]                 # (Cout, Cin)

    # Fuse the 1x1 shortcut into the conv1 matmul: its weights occupy the centre-tap
    # (k=4) columns of a second block of output rows.  Biases/BN shifts become the
    # last weight column (paired with the ones-row appended to the im2col columns).
    ws_embed = jnp.zeros((Cout, 9 * Cin), jnp.float32).at[:, 4 * Cin:5 * Cin].set(ws)
    wa = jnp.concatenate(
        [jnp.concatenate([w1, b1[:, None]], axis=1),
         jnp.concatenate([ws_embed, bs[:, None]], axis=1)], axis=0)   # (2*Cout, 9*Cin+1)
    w2b = jnp.concatenate([w2, b2[:, None]], axis=1)                  # (Cout, 9*Cout+1)

    # Per-tap validity mask, tiled once per sample inside a block (block boundaries
    # always coincide with sample boundaries, so one block-sized mask serves all steps).
    mask_blk = jnp.tile(jnp.asarray(_tap_masks(H, W)), (1, spb))      # (9, lanes)

    # VMEM budget from the actual per-step buffers (double-buffered I/O + constants +
    # headroom for register spills of the in-vreg im2col columns), clamped to limits
    # that are safe on v5e/v6e (128 MiB) and v7x (64 MiB physical).
    fp = 4
    per_step = fp * (
        2 * (Cin + Cout) * lanes              # double-buffered x / out blocks
        + 2 * 9 * lanes                       # mask
        + 2 * (wa.size + w2b.size)            # folded weights
        + (9 * Cin + 9 * Cout + 2) * lanes    # im2col columns (worst-case spill)
        + 4 * Cout * lanes                    # intermediates
    )
    vmem_limit = int(min(64 * 1024 * 1024, max(16 * 1024 * 1024, 2 * per_step)))

    kernel = functools.partial(_dcr_kernel, width=W, cout=Cout)
    const2 = lambda g: (0, 0)

    out = pl.pallas_call(
        kernel,
        out_shape=jax.ShapeDtypeStruct((Cout, N * HW), jnp.float32),
        grid_spec=pltpu.PrefetchScalarGridSpec(
            num_scalar_prefetch=0,
            grid=(G,),
            in_specs=[
                pl.BlockSpec((Cin, lanes), lambda g: (0, g)),
                pl.BlockSpec((9, lanes), const2),
                pl.BlockSpec((2 * Cout, 9 * Cin + 1), const2),
                pl.BlockSpec((Cout, 9 * Cout + 1), const2),
            ],
            out_specs=pl.BlockSpec((Cout, lanes), lambda g: (0, g)),
        ),
        compiler_params=pltpu.CompilerParams(
            dimension_semantics=("parallel",),
            vmem_limit_bytes=vmem_limit,
        ),
    )(x, mask_blk, wa, w2b)

    # (Cout, N*HW) -> (N, Cout, H, W)
    return jnp.transpose(out.reshape(Cout, N, H, W), (1, 0, 2, 3))


# ---------------- reference (plain JAX, NCHW like PyTorch) ----------------
def _ref_forward(x, p):
    def conv(x, w, b, pad):
        y = jax.lax.conv_general_dilated(
            x, w, window_strides=(1, 1), padding=[(pad, pad), (pad, pad)],
            dimension_numbers=("NCHW", "OIHW", "NCHW"))
        return y + b[None, :, None, None]

    def bn(x, g, be, m, v):
        return (x - m[None, :, None, None]) / jnp.sqrt(v[None, :, None, None] + BN_EPS) \
               * g[None, :, None, None] + be[None, :, None, None]

    y = _leaky(bn(conv(x, p["w1_t"], p["b1"], 1), p["g1"], p["be1"], p["m1"], p["v1"]))
    y = _leaky(bn(conv(y, p["w2_t"], p["b2"], 1), p["g2"], p["be2"], p["m2"], p["v2"]))
    r = _leaky(bn(conv(x, p["ws_t"], p["bs"], 0), p["gs"], p["bes"], p["ms"], p["vs"]))
    return y + r


def _make_params(key, cin, cout):
    ks = jax.random.split(key, 16)
    u = lambda k, s, lo, hi: jax.random.uniform(k, s, jnp.float32, lo, hi)
    return {
        # conv weights (torch OIHW) and biases
        "w1_t": 0.2 * jax.random.normal(ks[0], (cout, cin, 3, 3), jnp.float32),
        "b1": 0.1 * jax.random.normal(ks[1], (cout,), jnp.float32),
        "w2_t": 0.2 * jax.random.normal(ks[2], (cout, cout, 3, 3), jnp.float32),
        "b2": 0.1 * jax.random.normal(ks[3], (cout,), jnp.float32),
        "ws_t": 0.2 * jax.random.normal(ks[4], (cout, cin, 1, 1), jnp.float32),
        "bs": 0.1 * jax.random.normal(ks[5], (cout,), jnp.float32),
        # BN params (gamma, beta, running_mean, running_var)
        "g1": u(ks[6], (cout,), 0.8, 1.2), "be1": 0.1 * jax.random.normal(ks[7], (cout,)),
        "m1": 0.1 * jax.random.normal(ks[8], (cout,)), "v1": u(ks[9], (cout,), 0.5, 1.5),
        "g2": u(ks[10], (cout,), 0.8, 1.2), "be2": 0.1 * jax.random.normal(ks[11], (cout,)),
        "m2": 0.1 * jax.random.normal(ks[12], (cout,)), "v2": u(ks[13], (cout,), 0.5, 1.5),
        "gs": u(ks[14], (cout,), 0.8, 1.2), "bes": jnp.zeros((cout,), jnp.float32),
        "ms": jnp.zeros((cout,), jnp.float32), "vs": u(ks[15], (cout,), 0.5, 1.5),
    }


if __name__ == "__main__":
    N, Cin, Cout, H, W = 2, 4, 8, 16, 16
    key = jax.random.PRNGKey(0)
    kx, kp = jax.random.split(key)
    x = jax.random.normal(kx, (N, Cin, H, W), jnp.float32)
    params = _make_params(kp, Cin, Cout)

    out = jax.block_until_ready(double_conv3x3_residual(x, params))
    ref = jax.block_until_ready(_ref_forward(x, params))

    if not np.allclose(np.asarray(out), np.asarray(ref), rtol=1e-4, atol=1e-4):
        raise AssertionError("Pallas kernel does not match reference")
    print("KERNEL_OK")
</pallas_src>

<mosaic_0001>
module attributes {stable_mosaic.version = 11 : i64} {
  func.func @_dcr_kernel(%arg0: i32, %arg1: memref<4x512xf32, #tpu.memory_space<vmem>>, %arg2: memref<9x512xf32, #tpu.memory_space<vmem>>, %arg3: memref<16x37xf32, #tpu.memory_space<vmem>>, %arg4: memref<8x73xf32, #tpu.memory_space<vmem>>, %arg5: memref<8x512xf32, #tpu.memory_space<vmem>>) attributes {dimension_semantics = [#tpu.dimension_semantics<parallel>], iteration_bounds = array<i64: 1>, scalar_prefetch = 0 : i64, scratch_operands = 0 : i64, tpu.core_type = #tpu.core_type<tc>, window_params = [{transform_indices = @transform_0, window_bounds = array<i64: 4, 512>}, {pipeline_mode = #tpu.pipeline_mode<synchronous>, transform_indices = @transform_1, window_bounds = array<i64: 9, 512>}, {pipeline_mode = #tpu.pipeline_mode<synchronous>, transform_indices = @transform_2, window_bounds = array<i64: 16, 37>}, {pipeline_mode = #tpu.pipeline_mode<synchronous>, transform_indices = @transform_3, window_bounds = array<i64: 8, 73>}, {transform_indices = @transform_4, window_bounds = array<i64: 8, 512>}]} {
    %c0 = arith.constant 0 : index
    %c0_0 = arith.constant 0 : index
    %0 = vector.load %arg1[%c0, %c0_0] : memref<4x512xf32, #tpu.memory_space<vmem>>, vector<4x512xf32>
    %c0_1 = arith.constant 0 : index
    %c0_2 = arith.constant 0 : index
    %1 = vector.load %arg2[%c0_1, %c0_2] : memref<9x512xf32, #tpu.memory_space<vmem>>, vector<9x512xf32>
    %cst = arith.constant 1.000000e+00 : f32
    %2 = vector.broadcast %cst : f32 to vector<1x512xf32>
    %c0_3 = arith.constant 0 : index
    %c0_4 = arith.constant 0 : index
    %3 = vector.load %arg3[%c0_3, %c0_4] : memref<16x37xf32, #tpu.memory_space<vmem>>, vector<16x37xf32>
    %c17_i32 = arith.constant 17 : i32
    %4 = tpu.dynamic_rotate %0 by %c17_i32 dim 1 : vector<4x512xf32>, i32 -> vector<4x512xf32>
    %5 = vector.extract_strided_slice %1 {offsets = [0, 0], sizes = [1, 512], strides = [1, 1]} : vector<9x512xf32> to vector<1x512xf32>
    %6 = vector.broadcast %5 : vector<1x512xf32> to vector<4x512xf32>
    %7 = arith.mulf %4, %6 : vector<4x512xf32>
    %c16_i32 = arith.constant 16 : i32
    %8 = tpu.dynamic_rotate %0 by %c16_i32 dim 1 : vector<4x512xf32>, i32 -> vector<4x512xf32>
    %9 = vector.extract_strided_slice %1 {offsets = [1, 0], sizes = [1, 512], strides = [1, 1]} : vector<9x512xf32> to vector<1x512xf32>
    %10 = vector.broadcast %9 : vector<1x512xf32> to vector<4x512xf32>
    %11 = arith.mulf %8, %10 : vector<4x512xf32>
    %c15_i32 = arith.constant 15 : i32
    %12 = tpu.dynamic_rotate %0 by %c15_i32 dim 1 : vector<4x512xf32>, i32 -> vector<4x512xf32>
    %13 = vector.extract_strided_slice %1 {offsets = [2, 0], sizes = [1, 512], strides = [1, 1]} : vector<9x512xf32> to vector<1x512xf32>
    %14 = vector.broadcast %13 : vector<1x512xf32> to vector<4x512xf32>
    %15 = arith.mulf %12, %14 : vector<4x512xf32>
    %c1_i32 = arith.constant 1 : i32
    %16 = tpu.dynamic_rotate %0 by %c1_i32 dim 1 : vector<4x512xf32>, i32 -> vector<4x512xf32>
    %17 = vector.extract_strided_slice %1 {offsets = [3, 0], sizes = [1, 512], strides = [1, 1]} : vector<9x512xf32> to vector<1x512xf32>
    %18 = vector.broadcast %17 : vector<1x512xf32> to vector<4x512xf32>
    %19 = arith.mulf %16, %18 : vector<4x512xf32>
    %c511_i32 = arith.constant 511 : i32
    %20 = tpu.dynamic_rotate %0 by %c511_i32 dim 1 : vector<4x512xf32>, i32 -> vector<4x512xf32>
    %21 = vector.extract_strided_slice %1 {offsets = [5, 0], sizes = [1, 512], strides = [1, 1]} : vector<9x512xf32> to vector<1x512xf32>
    %22 = vector.broadcast %21 : vector<1x512xf32> to vector<4x512xf32>
    %23 = arith.mulf %20, %22 : vector<4x512xf32>
    %c497_i32 = arith.constant 497 : i32
    %24 = tpu.dynamic_rotate %0 by %c497_i32 dim 1 : vector<4x512xf32>, i32 -> vector<4x512xf32>
    %25 = vector.extract_strided_slice %1 {offsets = [6, 0], sizes = [1, 512], strides = [1, 1]} : vector<9x512xf32> to vector<1x512xf32>
    %26 = vector.broadcast %25 : vector<1x512xf32> to vector<4x512xf32>
    %27 = arith.mulf %24, %26 : vector<4x512xf32>
    %c496_i32 = arith.constant 496 : i32
    %28 = tpu.dynamic_rotate %0 by %c496_i32 dim 1 : vector<4x512xf32>, i32 -> vector<4x512xf32>
    %29 = vector.extract_strided_slice %1 {offsets = [7, 0], sizes = [1, 512], strides = [1, 1]} : vector<9x512xf32> to vector<1x512xf32>
    %30 = vector.broadcast %29 : vector<1x512xf32> to vector<4x512xf32>
    %31 = arith.mulf %28, %30 : vector<4x512xf32>
    %c495_i32 = arith.constant 495 : i32
    %32 = tpu.dynamic_rotate %0 by %c495_i32 dim 1 : vector<4x512xf32>, i32 -> vector<4x512xf32>
    %33 = vector.extract_strided_slice %1 {offsets = [8, 0], sizes = [1, 512], strides = [1, 1]} : vector<9x512xf32> to vector<1x512xf32>
    %34 = vector.broadcast %33 : vector<1x512xf32> to vector<4x512xf32>
    %35 = arith.mulf %32, %34 : vector<4x512xf32>
    %36 = tpu.concatenate %7, %11, %15, %19, %0, %23, %27, %31, %35, %2 in 0 : vector<4x512xf32>, vector<4x512xf32>, vector<4x512xf32>, vector<4x512xf32>, vector<4x512xf32>, vector<4x512xf32>, vector<4x512xf32>, vector<4x512xf32>, vector<4x512xf32>, vector<1x512xf32> -> vector<37x512xf32>
    %cst_5 = arith.constant dense<0.000000e+00> : vector<16x512xf32>
    %37 = tpu.matmul %3, %36, %cst_5 {dimension_numbers = #tpu.dot_dimension_numbers<[1], [0], [0], [1], [0, 0, 1, 1], [], []>} : vector<16x37xf32>, vector<37x512xf32>, vector<16x512xf32> -> vector<16x512xf32>
    %cst_6 = arith.constant 0.000000e+00 : f32
    %38 = vector.broadcast %cst_6 : f32 to vector<16x512xf32>
    %39 = arith.cmpf ogt, %37, %38 : vector<16x512xf32>
    %cst_7 = arith.constant 0.00999999977 : f32
    %40 = vector.broadcast %cst_7 : f32 to vector<16x512xf32>
    %41 = arith.mulf %40, %37 : vector<16x512xf32>
    %42 = arith.select %39, %37, %41 : vector<16x512xi1>, vector<16x512xf32>
    %43 = vector.extract_strided_slice %42 {offsets = [0, 0], sizes = [8, 512], strides = [1, 1]} : vector<16x512xf32> to vector<8x512xf32>
    %44 = vector.extract_strided_slice %42 {offsets = [8, 0], sizes = [8, 512], strides = [1, 1]} : vector<16x512xf32> to vector<8x512xf32>
    %c0_8 = arith.constant 0 : index
    %c0_9 = arith.constant 0 : index
    %45 = vector.load %arg4[%c0_8, %c0_9] : memref<8x73xf32, #tpu.memory_space<vmem>>, vector<8x73xf32>
    %c17_i32_10 = arith.constant 17 : i32
    %46 = tpu.dynamic_rotate %43 by %c17_i32_10 dim 1 : vector<8x512xf32>, i32 -> vector<8x512xf32>
    %47 = vector.extract_strided_slice %1 {offsets = [0, 0], sizes = [1, 512], strides = [1, 1]} : vector<9x512xf32> to vector<1x512xf32>
    %48 = vector.broadcast %47 : vector<1x512xf32> to vector<8x512xf32>
    %49 = arith.mulf %46, %48 : vector<8x512xf32>
    %c16_i32_11 = arith.constant 16 : i32
    %50 = tpu.dynamic_rotate %43 by %c16_i32_11 dim 1 : vector<8x512xf32>, i32 -> vector<8x512xf32>
    %51 = vector.extract_strided_slice %1 {offsets = [1, 0], sizes = [1, 512], strides = [1, 1]} : vector<9x512xf32> to vector<1x512xf32>
    %52 = vector.broadcast %51 : vector<1x512xf32> to vector<8x512xf32>
    %53 = arith.mulf %50, %52 : vector<8x512xf32>
    %c15_i32_12 = arith.constant 15 : i32
    %54 = tpu.dynamic_rotate %43 by %c15_i32_12 dim 1 : vector<8x512xf32>, i32 -> vector<8x512xf32>
    %55 = vector.extract_strided_slice %1 {offsets = [2, 0], sizes = [1, 512], strides = [1, 1]} : vector<9x512xf32> to vector<1x512xf32>
    %56 = vector.broadcast %55 : vector<1x512xf32> to vector<8x512xf32>
    %57 = arith.mulf %54, %56 : vector<8x512xf32>
    %c1_i32_13 = arith.constant 1 : i32
    %58 = tpu.dynamic_rotate %43 by %c1_i32_13 dim 1 : vector<8x512xf32>, i32 -> vector<8x512xf32>
    %59 = vector.extract_strided_slice %1 {offsets = [3, 0], sizes = [1, 512], strides = [1, 1]} : vector<9x512xf32> to vector<1x512xf32>
    %60 = vector.broadcast %59 : vector<1x512xf32> to vector<8x512xf32>
    %61 = arith.mulf %58, %60 : vector<8x512xf32>
    %c511_i32_14 = arith.constant 511 : i32
    %62 = tpu.dynamic_rotate %43 by %c511_i32_14 dim 1 : vector<8x512xf32>, i32 -> vector<8x512xf32>
    %63 = vector.extract_strided_slice %1 {offsets = [5, 0], sizes = [1, 512], strides = [1, 1]} : vector<9x512xf32> to vector<1x512xf32>
    %64 = vector.broadcast %63 : vector<1x512xf32> to vector<8x512xf32>
    %65 = arith.mulf %62, %64 : vector<8x512xf32>
    %c497_i32_15 = arith.constant 497 : i32
    %66 = tpu.dynamic_rotate %43 by %c497_i32_15 dim 1 : vector<8x512xf32>, i32 -> vector<8x512xf32>
    %67 = vector.extract_strided_slice %1 {offsets = [6, 0], sizes = [1, 512], strides = [1, 1]} : vector<9x512xf32> to vector<1x512xf32>
    %68 = vector.broadcast %67 : vector<1x512xf32> to vector<8x512xf32>
    %69 = arith.mulf %66, %68 : vector<8x512xf32>
    %c496_i32_16 = arith.constant 496 : i32
    %70 = tpu.dynamic_rotate %43 by %c496_i32_16 dim 1 : vector<8x512xf32>, i32 -> vector<8x512xf32>
    %71 = vector.extract_strided_slice %1 {offsets = [7, 0], sizes = [1, 512], strides = [1, 1]} : vector<9x512xf32> to vector<1x512xf32>
    %72 = vector.broadcast %71 : vector<1x512xf32> to vector<8x512xf32>
    %73 = arith.mulf %70, %72 : vector<8x512xf32>
    %c495_i32_17 = arith.constant 495 : i32
    %74 = tpu.dynamic_rotate %43 by %c495_i32_17 dim 1 : vector<8x512xf32>, i32 -> vector<8x512xf32>
    %75 = vector.extract_strided_slice %1 {offsets = [8, 0], sizes = [1, 512], strides = [1, 1]} : vector<9x512xf32> to vector<1x512xf32>
    %76 = vector.broadcast %75 : vector<1x512xf32> to vector<8x512xf32>
    %77 = arith.mulf %74, %76 : vector<8x512xf32>
    %78 = tpu.concatenate %49, %53, %57, %61, %43, %65, %69, %73, %77, %2 in 0 : vector<8x512xf32>, vector<8x512xf32>, vector<8x512xf32>, vector<8x512xf32>, vector<8x512xf32>, vector<8x512xf32>, vector<8x512xf32>, vector<8x512xf32>, vector<8x512xf32>, vector<1x512xf32> -> vector<73x512xf32>
    %cst_18 = arith.constant dense<0.000000e+00> : vector<8x512xf32>
    %79 = tpu.matmul %45, %78, %cst_18 {dimension_numbers = #tpu.dot_dimension_numbers<[1], [0], [0], [1], [0, 0, 1, 1], [], []>} : vector<8x73xf32>, vector<73x512xf32>, vector<8x512xf32> -> vector<8x512xf32>
    %cst_19 = arith.constant 0.000000e+00 : f32
    %80 = vector.broadcast %cst_19 : f32 to vector<8x512xf32>
    %81 = arith.cmpf ogt, %79, %80 : vector<8x512xf32>
    %cst_20 = arith.constant 0.00999999977 : f32
    %82 = vector.broadcast %cst_20 : f32 to vector<8x512xf32>
    %83 = arith.mulf %82, %79 : vector<8x512xf32>
    %84 = arith.select %81, %79, %83 : vector<8x512xi1>, vector<8x512xf32>
    %85 = arith.addf %84, %44 : vector<8x512xf32>
    %c0_21 = arith.constant 0 : index
    %c0_22 = arith.constant 0 : index
    %86 = vector.load %arg5[%c0_21, %c0_22] : memref<8x512xf32, #tpu.memory_space<vmem>>, vector<8x512xf32>
    tpu.vector_store %arg5[%c0_21, %c0_22], %85 {strides = array<i32>} : memref<8x512xf32, #tpu.memory_space<vmem>>, vector<8x512xf32>,
    return
  }
  func.func @transform_0(%arg0: i32) -> (i32, i32) {
    %c0_i32 = arith.constant 0 : i32
    %c0_i32_0 = arith.constant 0 : i32
    return %c0_i32, %arg0 : i32, i32
  }
  func.func @transform_1(%arg0: i32) -> (i32, i32) {
    %c0_i32 = arith.constant 0 : i32
    %c0_i32_0 = arith.constant 0 : i32
    %c0_i32_1 = arith.constant 0 : i32
    return %c0_i32, %c0_i32_0 : i32, i32
  }
  func.func @transform_2(%arg0: i32) -> (i32, i32) {
    %c0_i32 = arith.constant 0 : i32
    %c0_i32_0 = arith.constant 0 : i32
    %c0_i32_1 = arith.constant 0 : i32
    return %c0_i32, %c0_i32_0 : i32, i32
  }
  func.func @transform_3(%arg0: i32) -> (i32, i32) {
    %c0_i32 = arith.constant 0 : i32
    %c0_i32_0 = arith.constant 0 : i32
    %c0_i32_1 = arith.constant 0 : i32
    return %c0_i32, %c0_i32_0 : i32, i32
  }
  func.func @transform_4(%arg0: i32) -> (i32, i32) {
    %c0_i32 = arith.constant 0 : i32
    %c0_i32_0 = arith.constant 0 : i32
    return %c0_i32, %arg0 : i32, i32
  }
}

</mosaic_0001>

<bundles_post_ra>
// kernel: tpu_custom_call.1
= control target key start
LH: loop header
LB: loop body
LE: loop exit
PB: predicated region body
PF: predicated region fallthrough
CT: control target
= control target key end

     0   :  { %9 = vsyncpa [#allocation3], 0  ;;  %s1644_s0 = inlined_call_operand.hbm [shape: f32[4,512], index: 0, kind: input, shape index: {}]   ;;  %s1645_s1 = inlined_call_operand.hbm [shape: f32[9,512], index: 1, kind: input, shape index: {}]   ;;  %s1646_s2 = inlined_call_operand.hbm [shape: f32[16,37], index: 2, kind: input, shape index: {}]   ;;  %s1647_s3 = inlined_call_operand.hbm [shape: f32[8,73], index: 3, kind: input, shape index: {}]   ;;  %s1648_s4 = inlined_call_operand.hbm [shape: f32[8,512], index: 4, kind: output, shape index: {}]  }
   0x1   :  { %10 = vsyncpa [#allocation6], 0 }
   0x2   :  { %11 = vsyncpa [#allocation9], 0 }
   0x3   :  { %12 = vsyncpa [#allocation4], 0  ;;  %s1083_s15 = smov [#allocation5]  }
   0x4   :  { %s28_s16 = sshll.u32 %s1083_s15, 4  ;;  %s29_s16 = int_to_ptr.vmem [resolvable:$true] %s28_s16 }
   0x5   :  { %s983_s17 = scalar_lea.vmem %s29_s16, 1024  ;;  %p988_p1 = scmp.lt.s32.totalorder %s29_s16, %s29_s16 }
   0x6   :  { %p984_p0 = scmp.ne.s32.totalorder %s29_s16, %s983_s17  ;;  %p989_p2 = scmp.lt.s32.totalorder %s983_s17, %s983_s17 }
   0x8   :  { %p990_p3 = por %p989_p2, %p988_p1 }
   0xa   :  { %p991_p4 = pnand %p990_p3, %p984_p0 }
   0xc   :  { %994 = shalt.err (!%p991_p4)
}
   0xd   :  { %s1084_s18 = smov 512   ;;  %s1085_s19 = smov 32  }
   0xe   :  { %34 = dma.hbm_to_vmem [thread:$0]  %s1645_s1, 1024, %s29_s16, [#allocation6], %s1084_s18, %s1084_s18, %s1085_s19  }
   0xf   :  { %s1086_s22 = smov [#allocation2]   ;;  %s1087_s24 = smov [#allocation7]  }
  0x10   :  { %s19_s23 = sshll.u32 %s1086_s22, 4  ;;  %s40_s25 = sshll.u32 %s1087_s24, 4  ;;  %s20_s23 = int_to_ptr.vmem [resolvable:$true] %s19_s23  ;;  %s41_s25 = int_to_ptr.vmem [resolvable:$true] %s40_s25 }
  0x11   :  { %s1003_s26 = scalar_lea.vmem %s20_s23, 256  ;;  %p1008_p6 = scmp.lt.s32.totalorder %s20_s23, %s20_s23 }
  0x12   :  { %p1004_p5 = scmp.ne.s32.totalorder %s20_s23, %s1003_s26  ;;  %p1009_p7 = scmp.lt.s32.totalorder %s1003_s26, %s1003_s26 }
  0x14   :  { %p1010_p8 = por %p1009_p7, %p1008_p6 }
  0x16   :  { %p1011_p9 = pnand %p1010_p8, %p1004_p5 }
  0x18   :  { %1014 = shalt.err (!%p1011_p9)
}
  0x19   :  { %22 = dma.hbm_to_vmem [thread:$0]  %s1644_s0, 256, %s20_s23, [#allocation3]  }
  0x1a   :  { %s1023_s29 = scalar_lea.vmem %s41_s25, 256  ;;  %p1028_p11 = scmp.lt.s32.totalorder %s41_s25, %s41_s25 }
  0x1b   :  { %p1024_p10 = scmp.ne.s32.totalorder %s41_s25, %s1023_s29  ;;  %p1029_p12 = scmp.lt.s32.totalorder %s1023_s29, %s1023_s29 }
  0x1d   :  { %p1030_p13 = por %p1029_p12, %p1028_p11 }
  0x1f   :  { %p1031_p0 = pnand %p1030_p13, %p1024_p10 }
  0x21   :  { %1034 = shalt.err (!%p1031_p0)
}
  0x22   :  { %s1088_s1 = smov 128   ;;  %s1089_s30 = smov 8  }
  0x23   :  { %46 = dma.hbm_to_vmem [thread:$0]  %s1646_s2, 256, %s41_s25, [#allocation6], %s1088_s1, %s1088_s1, %s1089_s30  }
  0x24   :  { %s1090_s7 = smov [#allocation8]  }
  0x25   :  { %s53_s8 = sshll.u32 %s1090_s7, 4  ;;  %s54_s8 = int_to_ptr.vmem [resolvable:$true] %s53_s8 }
  0x26   :  { %s1043_s9 = scalar_lea.vmem %s54_s8, 128  ;;  %p1048_p2 = scmp.lt.s32.totalorder %s54_s8, %s54_s8 }
  0x27   :  { %p1044_p1 = scmp.ne.s32.totalorder %s54_s8, %s1043_s9  ;;  %p1049_p3 = scmp.lt.s32.totalorder %s1043_s9, %s1043_s9 }
  0x29   :  { %p1050_p4 = por %p1049_p3, %p1048_p2 }
  0x2b   :  { %p1051_p5 = pnand %p1050_p4, %p1044_p1 }
  0x2d   :  { %1054 = shalt.err (!%p1051_p5)
}
  0x2e   :  { %56 = dma.hbm_to_vmem [thread:$0]  %s1647_s3, 128, %s54_s8, [#allocation9]  }
  0x2f   :  { %1075 = dma.done.wait [#allocation3], 256  }
  0x30   :  { %1076 = vsyncadd [#allocation3], 4294967040 }
  0x31   :  { %1077 = dma.done.wait [#allocation6], 1280  }
  0x32   :  { %1078 = vsyncadd [#allocation6], 4294966016 }
  0x33   :  { %1079 = dma.done.wait [#allocation9], 128  }
  0x34   :  { %1080 = vsyncadd [#allocation9], 4294967168  ;;  %v1139_v0 = vld [vmem:[#allocation2 + $0x8] sm:$0xff]  ;;  %v1141_v1 = vld [vmem:[#allocation2] sm:$0xff]  ;;  %s1091_s2 = smov 112   ;;  %s1092_s3 = smov 111   ;;  %v95_v7 = vlaneseq }
  0x35   :  { %291 = vrot.lane.b32.xlu1 %v1139_v0, %s1091_s2  ;;  %287 = vrot.lane.b32.xlu0 %v1141_v1, %s1091_s2  ;;  %v1149_v2 = vcombine.high %v1139_v0, %v1139_v0  ;;  %v1157_v3 = vcombine.high %v1141_v1, %v1141_v1  ;;  %s1093_s11 = smov 127   ;;  %s1094_s12 = smov 113   ;;  %v1098_v4 = vmov 0.0   ;;  %v1222_v14 = vld [vmem:[#allocation5 + $0x20] ss:$0 sm:$0xff]  ;;  %vm401_vm1 = vcmask 1043456  }
  0x36   :  { %s1095_s13 = smov 1   ;;  %s1096_s14 = smov 16   ;;  %506 = vmatprep.mubr.f32.mxu0 %v1098_v4  ;;  %583 = vmatprep.mubr.f32.mxu1 %v1098_v4  ;;  %v1217_v10 = vand.u32 127, %v95_v7  ;;  %v1220_v13 = vshrl.u32 %v95_v7, 7  ;;  %v1226_v16 = vld [vmem:[#allocation5 + $0x30] ss:$0 sm:$0xff] }
  0x37   :  { %s1097_s15 = smov 15   ;;  %s1099_s16 = smov 17   ;;  %v1228_v17 = vld [vmem:[#allocation5 + $0x28] ss:$0 sm:$0xff]  ;;  %v1230_v18 = vld [vmem:[#allocation5 + $0x38] ss:$0 sm:$0xff] }
  0x38   :  { %vm328_vm0 = vcmp.lt.s32.totalorder %v1217_v10, 111  ;;  %vm429_vm2 = vcmask 1044480   ;;  %v302_v28 = vsub.s32 7, %v1220_v13  ;;  %v1243_v29 = vld [vmem:[#allocation5 + $0x10] sm:$0xff]  ;;  %v1245_v30 = vld [vmem:[#allocation5 + $0x18] sm:$0xff]  ;;  %v1247_v31 = vld [vmem:[#allocation5 + $0x8] sm:$0xff] }
  0x39   :  { %293 = vrot.lane.b32.xlu1 %v1149_v2, %s1091_s2  ;;  %320 = vrot.lane.b32.xlu0 %v1141_v1, %s1092_s3  ;;  %vm295_vm3 = vcmp.lt.s32.totalorder %v1217_v10, 112  ;;  %v1256_v38 = vld [vmem:[#allocation5] sm:$0xff]  ;;  %v236_v39 = vsub.s32 5, %v1220_v13  ;;  %vm229_vm4 = vcmp.lt.s32.totalorder %v1217_v10, 127  ;;  %v269_v51 = vsub.s32 6, %v1220_v13  ;;  %s1101_s17 = smov [#allocation10]  }
  0x3a   :  { %v1262_v40 = vrot.slane %v1243_v29, %v302_v28  ;;  %v1265_v41 = vrot.slane %v1245_v30, %v302_v28  ;;  %v1268_v42 = vrot.slane %v1247_v31, %v302_v28  ;;  %v1279_v48 = vrot.slane %v1256_v38, %v302_v28  ;;  %s925_s18 = sshll.u32 %s1101_s17, 4  ;;  %s926_s18 = int_to_ptr.vmem [resolvable:$true] %s925_s18 }
  0x3b   :  { %v1276_v45 = vrot.slane %v1245_v30, %v236_v39  ;;  %v1287_v52 = vrot.slane %v1256_v38, %v236_v39  ;;  %v1290_v53 = vrot.slane %v1247_v31, %v236_v39  ;;  %v1293_v54 = vrot.slane %v1243_v29, %v236_v39  ;;  %s1055_s19 = scalar_lea.vmem %s926_s18, 512  ;;  %p1060_p7 = scmp.lt.s32.totalorder %s926_s18, %s926_s18 }
  0x3c   :  { %vm262_vm5 = vcmp.lt.s32.totalorder %v1217_v10, 113  ;;  %v1309_v7 = vrot.slane %v1256_v38, %v269_v51  ;;  %vm196_vm6 = vcmp.lt.s32.totalorder %v1217_v10, 1  ;;  %vm130_vm7 = vcmp.lt.s32.totalorder %v1217_v10, 16  ;;  %p1056_p6 = scmp.ne.s32.totalorder %s926_s18, %s1055_s19  ;;  %p1061_p8 = scmp.lt.s32.totalorder %s1055_s19, %s1055_s19 }
  0x3d   :  { %322 = vrot.lane.b32.xlu1 %v1157_v3, %s1092_s3  ;;  %289 = vrot.lane.b32.xlu0 %v1157_v3, %s1091_s2  ;;  %vm163_vm8 = vcmp.lt.s32.totalorder %v1217_v10, 15  ;;  %vm97_vm9 = vcmp.lt.s32.totalorder %v1217_v10, 17  ;;  %vm422_vm10 = vcmask 302080   ;;  %vm753_vm11 = vcmask 1040384  }
  0x3e   :  { %p1062_p9 = por %p1061_p8, %p1060_p7 }
  0x40   :  { %p1063_p10 = pnand %p1062_p9, %p1056_p6 }
  0x41   :  { %326 = vrot.lane.b32.xlu1 %v1149_v2, %s1092_s3  ;;  %324 = vrot.lane.b32.xlu0 %v1139_v0, %s1092_s3 }
  0x45   :  { %223 = vrot.lane.b32.xlu1 %v1157_v3, %s1093_s11  ;;  %221 = vrot.lane.b32.xlu0 %v1141_v1, %s1093_s11 }
  0x49   :  { %227 = vrot.lane.b32.xlu1 %v1149_v2, %s1093_s11  ;;  %225 = vrot.lane.b32.xlu0 %v1139_v0, %s1093_s11 }
  0x4d   :  { %256 = vrot.lane.b32.xlu1 %v1157_v3, %s1094_s12  ;;  %254 = vrot.lane.b32.xlu0 %v1141_v1, %s1094_s12 }
  0x51   :  { %260 = vrot.lane.b32.xlu1 %v1149_v2, %s1094_s12  ;;  %258 = vrot.lane.b32.xlu0 %v1139_v0, %s1094_s12 }
  0x55   :  { %190 = vrot.lane.b32.xlu1 %v1157_v3, %s1095_s13  ;;  %188 = vrot.lane.b32.xlu0 %v1141_v1, %s1095_s13 }
  0x59   :  { %194 = vrot.lane.b32.xlu1 %v1149_v2, %s1095_s13  ;;  %192 = vrot.lane.b32.xlu0 %v1139_v0, %s1095_s13 }
  0x5d   :  { %124 = vrot.lane.b32.xlu1 %v1157_v3, %s1096_s14  ;;  %122 = vrot.lane.b32.xlu0 %v1141_v1, %s1096_s14 }
  0x61   :  { %128 = vrot.lane.b32.xlu1 %v1149_v2, %s1096_s14  ;;  %126 = vrot.lane.b32.xlu0 %v1139_v0, %s1096_s14 }
  0x65   :  { %157 = vrot.lane.b32.xlu1 %v1157_v3, %s1097_s15  ;;  %155 = vrot.lane.b32.xlu0 %v1141_v1, %s1097_s15 }
  0x69   :  { %161 = vrot.lane.b32.xlu1 %v1149_v2, %s1097_s15  ;;  %159 = vrot.lane.b32.xlu0 %v1139_v0, %s1097_s15 }
  0x6d   :  { %89 = vrot.lane.b32.xlu1 %v1157_v3, %s1099_s16  ;;  %87 = vrot.lane.b32.xlu0 %v1141_v1, %s1099_s16 }
  0x71   :  { %93 = vrot.lane.b32.xlu1 %v1149_v2, %s1099_s16  ;;  %91 = vrot.lane.b32.xlu0 %v1139_v0, %s1099_s16 }
  0xa7   :  { %v292_v5 = vpop.permute.xlu1 %291  ;;  %v288_v6 = vpop.permute.xlu0 %287 }
  0xab   :  { %v294_v8 = vpop.permute.xlu1 %293  ;;  %v321_v9 = vpop.permute.xlu0 %320 }
  0xac   :  { %v296_v43 = vsel %vm295_vm3, %v292_v5, %v294_v8  ;;  %v299_v44 = vsel %vm295_vm3, %v294_v8, %v288_v6 }
  0xad   :  { %v318_v55 = vmul.f32 %v1262_v40, %v296_v43  ;;  %v319_v56 = vmul.f32 %v1265_v41, %v299_v44 }
  0xaf   :  { %v323_v11 = vpop.permute.xlu1 %322  ;;  %v290_v12 = vpop.permute.xlu0 %289 }
  0xb0   :  { %v331_v15 = vsel %vm328_vm0, %v321_v9, %v323_v11  ;;  %v297_v49 = vsel %vm295_vm3, %v290_v12, %v292_v5  ;;  %v298_v57 = vsel %vm295_vm3, %v288_v6, %v290_v12  ;;  %v1312_v6 = vrot.slane %v1245_v30, %v269_v51 }
  0xb1   :  { %v349_v21 = vmul.f32 %v1222_v14, %v331_v15  ;;  %v317_v59 = vmul.f32 %v1268_v42, %v297_v49  ;;  %v1321_v12 = vrot.slane %v1243_v29, %v269_v51  ;;  %v316_v15 = vmul.f32 %v1279_v48, %v298_v57 }
  0xb3   :  { %v327_v19 = vpop.permute.xlu1 %326  ;;  %v325_v20 = vpop.permute.xlu0 %324  ;;  %v418_v37 = vsel %vm401_vm1, %v349_v21, 1.0  ;;  %v395_v21 = vrot.slane %v318_v55, 4  ;;  %v393_v39 = vrot.slane %v316_v15, 4 }
  0xb4   :  { %v332_v22 = vsel %vm328_vm0, %v327_v19, %v321_v9  ;;  %v329_v23 = vsel %vm328_vm0, %v325_v20, %v327_v19  ;;  %v330_v24 = vsel %vm328_vm0, %v323_v11, %v325_v20  ;;  %v1318_v11 = vrot.slane %v1247_v31, %v269_v51 }
  0xb5   :  { %v351_v25 = vmul.f32 %v1226_v16, %v329_v23  ;;  %v350_v26 = vmul.f32 %v1228_v17, %v330_v24  ;;  %v352_v27 = vmul.f32 %v1230_v18, %v332_v22  ;;  %v396_v22 = vrot.slane %v319_v56, 4 }
  0xb6   :  { %v394_v23 = vrot.slane %v317_v59, 4 }
  0xb7   :  { %v224_v32 = vpop.permute.xlu1 %223  ;;  %v222_v33 = vpop.permute.xlu0 %221  ;;  %v419_v34 = vsel %vm401_vm1, %v350_v26, 1.0  ;;  %v421_v35 = vsel %vm401_vm1, %v352_v27, 1.0  ;;  %v420_v36 = vsel %vm401_vm1, %v351_v25, 1.0 }
  0xb8   :  { %940 = vmatprep.subr.msk.mxu0 %vm429_vm2, %v419_v34  ;;  %944 = vmatprep.subr.msk.mxu1 %vm429_vm2, %v421_v35  ;;  %v232_v60 = vsel %vm229_vm4, %v222_v33, %v224_v32 }
  0xb9   :  { %941 = vmatpush1.msk.msra.mxu0 %vm429_vm2, %v418_v37  ;;  %945 = vmatpush1.msk.msra.mxu1 %vm429_vm2, %v420_v36  ;;  %v250_v19 = vmul.f32 %v1287_v52, %v232_v60 }
  0xbb   :  { %v228_v46 = vpop.permute.xlu1 %227  ;;  %v226_v47 = vpop.permute.xlu0 %225  ;;  %v381_v43 = vrot.slane %v250_v19, 4  ;;  %v137_v19 = vsub.s32 1, %v1220_v13 }
  0xbc   :  { %v233_v50 = vsel %vm229_vm4, %v228_v46, %v222_v33  ;;  %v231_v58 = vsel %vm229_vm4, %v224_v32, %v226_v47  ;;  %v230_v62 = vsel %vm229_vm4, %v226_v47, %v228_v46 }
  0xbd   :  { %v253_v61 = vmul.f32 %v1276_v45, %v233_v50  ;;  %v251_v8 = vmul.f32 %v1290_v53, %v231_v58  ;;  %v252_v20 = vmul.f32 %v1293_v54, %v230_v62  ;;  %v410_v58 = vsel %vm401_vm1, %v1141_v1, %v381_v43 }
  0xbe   :  { %v203_v62 = vsub.s32 3, %v1220_v13 }
  0xbf   :  { %v257_v63 = vpop.permute.xlu1 %256  ;;  %v255_v5 = vpop.permute.xlu0 %254  ;;  %v384_v24 = vrot.slane %v253_v61, 4  ;;  %v382_v34 = vrot.slane %v251_v8, 4  ;;  %v383_v44 = vrot.slane %v252_v20, 4 }
  0xc0   :  { %v265_v9 = vsel %vm262_vm5, %v255_v5, %v257_v63  ;;  %v1365_v15 = vrot.slane %v1245_v30, %v203_v62 }
  0xc1   :  { %v283_v27 = vmul.f32 %v1309_v7, %v265_v9  ;;  %v411_v56 = vsel %vm401_vm1, %v1157_v3, %v382_v34  ;;  %v413_v57 = vsel %vm401_vm1, %v1149_v2, %v384_v24  ;;  %v412_v59 = vsel %vm401_vm1, %v1139_v0, %v383_v44 }
  0xc2   :  { %v1351_v2 = vrot.slane %v1247_v31, %v203_v62  ;;  %v1357_v0 = vrot.slane %v1256_v38, %v203_v62  ;;  %v1362_v9 = vrot.slane %v1243_v29, %v203_v62  ;;  %v1386_v34 = vrot.slane %v1256_v38, %v137_v19 }
  0xc3   :  { %v261_v25 = vpop.permute.xlu1 %260  ;;  %v259_v26 = vpop.permute.xlu0 %258  ;;  %v414_v55 = vsel %vm401_vm1, %v283_v27, %v393_v39  ;;  %v104_v27 = vsub.s32 0, %v1220_v13  ;;  %v1391_v39 = vrot.slane %v1243_v29, %v137_v19 }
  0xc4   :  { %v266_v28 = vsel %vm262_vm5, %v261_v25, %v255_v5  ;;  %v263_v32 = vsel %vm262_vm5, %v259_v26, %v261_v25  ;;  %v264_v33 = vsel %vm262_vm5, %v257_v63, %v259_v26  ;;  %v170_v5 = vsub.s32 2, %v1220_v13 }
  0xc5   :  { %v286_v35 = vmul.f32 %v1312_v6, %v266_v28  ;;  %v284_v36 = vmul.f32 %v1318_v11, %v264_v33  ;;  %v285_v37 = vmul.f32 %v1321_v12, %v263_v32  ;;  %v1383_v33 = vrot.slane %v1247_v31, %v137_v19 }
  0xc6   :  { %v1376_v25 = vrot.slane %v1247_v31, %v170_v5  ;;  %v1396_v43 = vrot.slane %v1256_v38, %v170_v5 }
  0xc7   :  { %v191_v46 = vpop.permute.xlu1 %190  ;;  %v189_v47 = vpop.permute.xlu0 %188  ;;  %v415_v49 = vsel %vm401_vm1, %v284_v36, %v394_v23  ;;  %v417_v50 = vsel %vm401_vm1, %v286_v35, %v396_v22  ;;  %v416_v51 = vsel %vm401_vm1, %v285_v37, %v395_v21 }
  0xc8   :  { %466 = vmatprep.subr.mxu0 %v415_v49  ;;  %543 = vmatprep.subr.mxu1 %v417_v50  ;;  %v199_v1 = vsel %vm196_vm6, %v189_v47, %v191_v46  ;;  %v1403_v49 = vrot.slane %v1245_v30, %v170_v5 }
  0xc9   :  { %467 = vmatpush1.msra.mxu0 %v414_v55  ;;  %544 = vmatpush1.msra.mxu1 %v416_v51  ;;  %v218_v24 = vmul.f32 %v1351_v2, %v199_v1  ;;  %v1406_v51 = vrot.slane %v1245_v30, %v137_v19  ;;  %v1410_v55 = vrot.slane %v1247_v31, %v104_v27 }
  0xca   :  { %468 = vmatprep.subr.mxu0 %v411_v56  ;;  %545 = vmatprep.subr.mxu1 %v413_v57 }
  0xcb   :  { %v195_v60 = vpop.permute.xlu1 %194  ;;  %469 = vmatpush1.msra.mxu0 %v410_v58  ;;  %546 = vmatpush1.msra.mxu1 %v412_v59  ;;  %v193_v61 = vpop.permute.xlu0 %192  ;;  %v370_v44 = vrot.slane %v218_v24, 4  ;;  %v1430_v24 = vrot.slane %v1256_v38, %v104_v27  ;;  %v1440_v38 = vrot.slane %v1243_v29, %v104_v27 }
  0xcc   :  { %v200_v8 = vsel %vm196_vm6, %v195_v60, %v189_v47  ;;  %v197_v22 = vsel %vm196_vm6, %v193_v61, %v195_v60  ;;  %v198_v23 = vsel %vm196_vm6, %v191_v46, %v193_v61  ;;  %v1400_v47 = vrot.slane %v1243_v29, %v170_v5 }
  0xcd   :  { %v217_v26 = vmul.f32 %v1357_v0, %v200_v8  ;;  %v219_v28 = vmul.f32 %v1362_v9, %v198_v23  ;;  %v220_v32 = vmul.f32 %v1365_v15, %v197_v22 }
  0xcf   :  { %v125_v3 = vpop.permute.xlu1 %124  ;;  %v123_v63 = vpop.permute.xlu0 %122  ;;  %v369_v50 = vrot.slane %v217_v26, 4  ;;  %v371_v56 = vrot.slane %v219_v28, 4  ;;  %v372_v57 = vrot.slane %v220_v32, 4 }
  0xd0   :  { %v133_v37 = vsel %vm130_vm7, %v123_v63, %v125_v3 }
  0xd1   :  { %v152_v58 = vmul.f32 %v1383_v33, %v133_v37 }
  0xd3   :  { %v129_v20 = vpop.permute.xlu1 %128  ;;  %v127_v21 = vpop.permute.xlu0 %126 }
  0xd4   :  { %v134_v62 = vsel %vm130_vm7, %v129_v20, %v123_v63  ;;  %v132_v8 = vsel %vm130_vm7, %v125_v3, %v127_v21  ;;  %v131_v63 = vsel %vm130_vm7, %v127_v21, %v129_v20  ;;  %v358_v20 = vrot.slane %v152_v58, 4 }
  0xd5   :  { %v151_v26 = vmul.f32 %v1386_v34, %v134_v62  ;;  %v153_v37 = vmul.f32 %v1391_v39, %v132_v8  ;;  %v154_v21 = vmul.f32 %v1406_v51, %v131_v63 }
  0xd7   :  { %v158_v35 = vpop.permute.xlu1 %157  ;;  %v156_v36 = vpop.permute.xlu0 %155  ;;  %v360_v62 = vrot.slane %v154_v21, 4 }
  0xd8   :  { %v166_v13 = vsel %vm163_vm8, %v156_v36, %v158_v35 }
  0xd9   :  { %v185_v46 = vmul.f32 %v1376_v25, %v166_v13 }
  0xdb   :  { %v162_v59 = vpop.permute.xlu1 %161  ;;  %v160_v60 = vpop.permute.xlu0 %159  ;;  %v407_v61 = vsel %vm401_vm1, %v185_v46, %v370_v44  ;;  %v1445_v46 = vrot.slane %v1245_v30, %v104_v27 }
  0xdc   :  { %v167_v5 = vsel %vm163_vm8, %v162_v59, %v156_v36  ;;  %v164_v1 = vsel %vm163_vm8, %v160_v60, %v162_v59  ;;  %v165_v31 = vsel %vm163_vm8, %v158_v35, %v160_v60  ;;  %470 = vmatprep.subr.mxu0 %v407_v61  ;;  %v359_v60 = vrot.slane %v153_v37, 4 }
  0xdd   :  { %v184_v19 = vmul.f32 %v1396_v43, %v167_v5  ;;  %v186_v22 = vmul.f32 %v1400_v47, %v165_v31  ;;  %v187_v23 = vmul.f32 %v1403_v49, %v164_v1  ;;  %v79_v1 = vld [vmem:[#allocation7] sm:$0xff] }
  0xdf   :  { %v90_v28 = vpop.permute.xlu1 %89  ;;  %v88_v32 = vpop.permute.xlu0 %87  ;;  %v406_v35 = vsel %vm401_vm1, %v184_v19, %v369_v50  ;;  %v409_v3 = vsel %vm401_vm1, %v187_v23, %v372_v57  ;;  %v408_v36 = vsel %vm401_vm1, %v186_v22, %v371_v56  ;;  %v357_v50 = vrot.slane %v151_v26, 4 }
  0xe0   :  { %v100_v13 = vsel %vm97_vm9, %v88_v32, %v90_v28  ;;  %471 = vmatpush1.msra.mxu0 %v406_v35  ;;  %547 = vmatprep.subr.mxu1 %v409_v3  ;;  %v1100_v22 = vmov 1.0  }
  0xe1   :  { %v119_v44 = vmul.f32 %v1410_v55, %v100_v13  ;;  %548 = vmatpush1.msra.mxu1 %v408_v36 }
  0xe3   :  { %v94_v56 = vpop.permute.xlu1 %93  ;;  %v92_v57 = vpop.permute.xlu0 %91  ;;  %v403_v59 = vsel %vm401_vm1, %v119_v44, %v358_v20  ;;  %v80_v44 = vld [vmem:[#allocation7 + $0x8] sm:$0xff] }
  0xe4   :  { %v101_v61 = vsel %vm97_vm9, %v94_v56, %v88_v32  ;;  %v98_v29 = vsel %vm97_vm9, %v92_v57, %v94_v56  ;;  %v99_v58 = vsel %vm97_vm9, %v90_v28, %v92_v57  ;;  %472 = vmatprep.subr.mxu0 %v403_v59 }
  0xe5   :  { %v118_v30 = vmul.f32 %v1430_v24, %v101_v61  ;;  %v120_v27 = vmul.f32 %v1440_v38, %v99_v58  ;;  %v121_v5 = vmul.f32 %v1445_v46, %v98_v29 }
  0xe7   :  { %v402_v31 = vsel %vm401_vm1, %v118_v30, %v357_v50  ;;  %v405_v8 = vsel %vm401_vm1, %v121_v5, %v360_v62  ;;  %v404_v19 = vsel %vm401_vm1, %v120_v27, %v359_v60 }
  0xe8   :  { %473 = vmatpush1.msra.mxu0 %v402_v31  ;;  %549 = vmatprep.subr.mxu1 %v405_v8 }
  0xe9   :  { %942 = vmatmul.mubr.msk.f32.vlgmr.msra.gmra.mxu0 %vm422_vm10, %v79_v1  ;;  %550 = vmatpush1.msra.mxu1 %v404_v19 }
  0xea   :  { %946 = vmatmul.mubr.msk.f32.vlgmr.msra.gmra.mxu1 %vm422_vm10, %v79_v1  ;;  %512 = vmatprep.mubr.f32.mxu0 %v1098_v4 }
  0xeb   :  { %589 = vmatprep.mubr.f32.mxu1 %v1098_v4  ;;  %948 = vmatprep.subr.msk.mxu0 %vm753_vm11, %v1100_v22 }
  0xec   :  { %951 = vmatprep.subr.msk.mxu1 %vm753_vm11, %v1100_v22  ;;  %949 = vmatpush1.msk.msra.mxu0 %vm753_vm11, %v1100_v22 }
  0xed   :  { %952 = vmatpush1.msk.msra.mxu1 %vm753_vm11, %v1100_v22  ;;  %943 = vmatmul.mubr.msk.f32.gmra.mxu0 %vm422_vm10, %v80_v44 }
  0xee   :  { %947 = vmatmul.mubr.msk.f32.gmra.mxu1 %vm422_vm10, %v80_v44  ;;  %821 = vmatprep.mubr.f32.mxu0 %v1098_v4 }
  0xef   :  { %892 = vmatprep.mubr.f32.mxu1 %v1098_v4 }
 0x1a9   :  { %v508_v23 = vpop.f32.mrf.mxu0 }
 0x1aa   :  { %vm596_vm12 = vcmp.gt.f32.partialorder %v508_v23, 0.0  ;;  %v604_v63 = vmul.f32 0.01, %v508_v23  ;;  %v585_v26 = vpop.f32.mrf.mxu1 }
 0x1ab   :  { %v510_v28 = vpop.f32.mrf.mxu0  ;;  %v606_v35 = vmul.f32 0.01, %v585_v26  ;;  %vm598_vm14 = vcmp.gt.f32.partialorder %v585_v26, 0.0 }
 0x1ac   :  { %v1464_v32 = vsel %vm596_vm12, %v508_v23, %v604_v63  ;;  %vm597_vm13 = vcmp.gt.f32.partialorder %v510_v28, 0.0  ;;  %v605_v3 = vmul.f32 0.01, %v510_v28  ;;  %v587_v36 = vpop.f32.mrf.mxu1 }
 0x1ad   :  { %733 = vrot.lane.b32.xlu0 %v1464_v32, %s1092_s3  ;;  %v607_v13 = vmul.f32 0.01, %v587_v36  ;;  %vm599_vm15 = vcmp.gt.f32.partialorder %v587_v36, 0.0  ;;  %v1472_v20 = vsel %vm598_vm14, %v585_v26, %v606_v35 }
 0x1ae   :  { %v1468_v37 = vsel %vm597_vm13, %v510_v28, %v605_v3 }
 0x1af   :  { %735 = vrot.lane.b32.xlu1 %v1468_v37, %s1092_s3  ;;  %v1476_v21 = vsel %vm599_vm15, %v587_v36, %v607_v13 }
 0x1b1   :  { %737 = vrot.lane.b32.xlu0 %v1472_v20, %s1092_s3 }
 0x1b3   :  { %739 = vrot.lane.b32.xlu1 %v1476_v21, %s1092_s3 }
 0x1b5   :  { %717 = vrot.lane.b32.xlu0 %v1464_v32, %s1091_s2 }
 0x1b7   :  { %719 = vrot.lane.b32.xlu1 %v1468_v37, %s1091_s2 }
 0x1b9   :  { %721 = vrot.lane.b32.xlu0 %v1472_v20, %s1091_s2 }
 0x1bb   :  { %723 = vrot.lane.b32.xlu1 %v1476_v21, %s1091_s2 }
 0x1bd   :  { %701 = vrot.lane.b32.xlu0 %v1464_v32, %s1094_s12 }
 0x1bf   :  { %703 = vrot.lane.b32.xlu1 %v1468_v37, %s1094_s12 }
 0x1c1   :  { %705 = vrot.lane.b32.xlu0 %v1472_v20, %s1094_s12 }
 0x1c3   :  { %707 = vrot.lane.b32.xlu1 %v1476_v21, %s1094_s12 }
 0x1c5   :  { %685 = vrot.lane.b32.xlu0 %v1464_v32, %s1093_s11 }
 0x1c7   :  { %687 = vrot.lane.b32.xlu1 %v1468_v37, %s1093_s11 }
 0x1c9   :  { %689 = vrot.lane.b32.xlu0 %v1472_v20, %s1093_s11 }
 0x1cb   :  { %691 = vrot.lane.b32.xlu1 %v1476_v21, %s1093_s11 }
 0x1cd   :  { %669 = vrot.lane.b32.xlu0 %v1464_v32, %s1095_s13 }
 0x1cf   :  { %671 = vrot.lane.b32.xlu1 %v1468_v37, %s1095_s13 }
 0x1d1   :  { %673 = vrot.lane.b32.xlu0 %v1472_v20, %s1095_s13 }
 0x1d3   :  { %675 = vrot.lane.b32.xlu1 %v1476_v21, %s1095_s13 }
 0x1d5   :  { %653 = vrot.lane.b32.xlu0 %v1464_v32, %s1097_s15 }
 0x1d7   :  { %655 = vrot.lane.b32.xlu1 %v1468_v37, %s1097_s15 }
 0x1d9   :  { %657 = vrot.lane.b32.xlu0 %v1472_v20, %s1097_s15 }
 0x1db   :  { %659 = vrot.lane.b32.xlu1 %v1476_v21, %s1097_s15 }
 0x1dd   :  { %637 = vrot.lane.b32.xlu0 %v1464_v32, %s1096_s14 }
 0x1df   :  { %639 = vrot.lane.b32.xlu1 %v1468_v37, %s1096_s14 }
 0x1e1   :  { %641 = vrot.lane.b32.xlu0 %v1472_v20, %s1096_s14 }
 0x1e3   :  { %643 = vrot.lane.b32.xlu1 %v1476_v21, %s1096_s14 }
 0x1e5   :  { %621 = vrot.lane.b32.xlu0 %v1464_v32, %s1099_s16 }
 0x1e7   :  { %623 = vrot.lane.b32.xlu1 %v1468_v37, %s1099_s16 }
 0x1e9   :  { %625 = vrot.lane.b32.xlu0 %v1472_v20, %s1099_s16 }
 0x1eb   :  { %627 = vrot.lane.b32.xlu1 %v1476_v21, %s1099_s16 }
 0x21f   :  { %v734_v4 = vpop.permute.xlu0 %733 }
 0x221   :  { %v736_v50 = vpop.permute.xlu1 %735 }
 0x222   :  { %v743_v56 = vsel %vm328_vm0, %v734_v4, %v736_v50 }
 0x223   :  { %v738_v57 = vpop.permute.xlu0 %737  ;;  %v745_v29 = vmul.f32 %v1222_v14, %v743_v56 }
 0x224   :  { %v742_v59 = vsel %vm328_vm0, %v736_v50, %v738_v57 }
 0x225   :  { %v746_v60 = vmul.f32 %v1228_v17, %v742_v59  ;;  %v740_v61 = vpop.permute.xlu1 %739 }
 0x226   :  { %v741_v58 = vsel %vm328_vm0, %v738_v57, %v740_v61  ;;  %v744_v62 = vsel %vm328_vm0, %v740_v61, %v734_v4  ;;  %vm749_vm0 = vcmask 596992  }
 0x227   :  { %v747_v30 = vmul.f32 %v1226_v16, %v741_v58  ;;  %v748_v27 = vmul.f32 %v1230_v18, %v744_v62  ;;  %771 = vmatprep.subr.mxu0 %v746_v60  ;;  %v718_v5 = vpop.permute.xlu0 %717 }
 0x228   :  { %772 = vmatpush1.msra.mxu0 %v745_v29 }
 0x229   :  { %v720_v1 = vpop.permute.xlu1 %719  ;;  %842 = vmatprep.subr.mxu1 %v748_v27 }
 0x22a   :  { %843 = vmatpush1.msra.mxu1 %v747_v30  ;;  %v727_v17 = vsel %vm295_vm3, %v718_v5, %v720_v1 }
 0x22b   :  { %v722_v14 = vpop.permute.xlu0 %721  ;;  %v729_v16 = vmul.f32 %v727_v17, %v1279_v48 }
 0x22c   :  { %v726_v31 = vsel %vm295_vm3, %v720_v1, %v722_v14 }
 0x22d   :  { %v730_v8 = vmul.f32 %v726_v31, %v1268_v42  ;;  %v724_v19 = vpop.permute.xlu1 %723 }
 0x22e   :  { %v725_v18 = vsel %vm295_vm3, %v722_v14, %v724_v19  ;;  %v728_v22 = vsel %vm295_vm3, %v724_v19, %v718_v5 }
 0x22f   :  { %v731_v23 = vmul.f32 %v725_v18, %v1262_v40  ;;  %v732_v63 = vmul.f32 %v728_v22, %v1265_v41  ;;  %773 = vmatprep.subr.mxu0 %v730_v8  ;;  %v702_v26 = vpop.permute.xlu0 %701 }
 0x230   :  { %774 = vmatpush1.msra.mxu0 %v729_v16 }
 0x231   :  { %v704_v28 = vpop.permute.xlu1 %703  ;;  %844 = vmatprep.subr.mxu1 %v732_v63 }
 0x232   :  { %845 = vmatpush1.msra.mxu1 %v731_v23  ;;  %v711_v42 = vsel %vm262_vm5, %v702_v26, %v704_v28 }
 0x233   :  { %v706_v48 = vpop.permute.xlu0 %705  ;;  %v713_v40 = vmul.f32 %v711_v42, %v1309_v7 }
 0x234   :  { %v710_v35 = vsel %vm262_vm5, %v704_v28, %v706_v48 }
 0x235   :  { %v714_v3 = vmul.f32 %v710_v35, %v1318_v11  ;;  %v708_v36 = vpop.permute.xlu1 %707 }
 0x236   :  { %v709_v41 = vsel %vm262_vm5, %v706_v48, %v708_v36  ;;  %v712_v13 = vsel %vm262_vm5, %v708_v36, %v702_v26 }
 0x237   :  { %v715_v44 = vmul.f32 %v709_v41, %v1321_v12  ;;  %v716_v4 = vmul.f32 %v712_v13, %v1312_v6  ;;  %775 = vmatprep.subr.mxu0 %v714_v3  ;;  %v686_v50 = vpop.permute.xlu0 %685 }
 0x238   :  { %776 = vmatpush1.msra.mxu0 %v713_v40 }
 0x239   :  { %v688_v56 = vpop.permute.xlu1 %687  ;;  %846 = vmatprep.subr.mxu1 %v716_v4 }
 0x23a   :  { %847 = vmatpush1.msra.mxu1 %v715_v44  ;;  %v695_v11 = vsel %vm229_vm4, %v686_v50, %v688_v56 }
 0x23b   :  { %v690_v7 = vpop.permute.xlu0 %689  ;;  %v697_v12 = vmul.f32 %v695_v11, %v1287_v52  ;;  %v591_v11 = vpop.f32.mrf.mxu1 }
 0x23c   :  { %v694_v57 = vsel %vm229_vm4, %v688_v56, %v690_v7  ;;  %v514_v56 = vpop.f32.mrf.mxu0  ;;  %v610_v10 = vmul.f32 0.01, %v591_v11  ;;  %vm602_vm2 = vcmp.gt.f32.partialorder %v591_v11, 0.0 }
 0x23d   :  { %v698_v59 = vmul.f32 %v694_v57, %v1290_v53  ;;  %v692_v60 = vpop.permute.xlu1 %691  ;;  %vm600_vm1 = vcmp.gt.f32.partialorder %v514_v56, 0.0 }
 0x23e   :  { %v693_v6 = vsel %vm229_vm4, %v690_v7, %v692_v60  ;;  %v696_v61 = vsel %vm229_vm4, %v692_v60, %v686_v50  ;;  %v620_v50 = vld [vmem:[#allocation8] sm:$0xff]  ;;  %v608_v7 = vmul.f32 0.01, %v514_v56  ;;  %v516_v57 = vpop.f32.mrf.mxu0 }
 0x23f   :  { %v699_v29 = vmul.f32 %v693_v6, %v1293_v54  ;;  %v700_v58 = vmul.f32 %v696_v61, %v1276_v45  ;;  %777 = vmatprep.subr.mxu0 %v698_v59  ;;  %v670_v62 = vpop.permute.xlu0 %669  ;;  %v593_v59 = vpop.f32.mrf.mxu1  ;;  %vm601_vm3 = vcmp.gt.f32.partialorder %v516_v57, 0.0  ;;  %v609_v60 = vmul.f32 0.01, %v516_v57 }
 0x240   :  { %778 = vmatpush1.msra.mxu0 %v697_v12  ;;  %v618_v6 = vsel %vm602_vm2, %v591_v11, %v610_v10  ;;  %v611_v61 = vmul.f32 0.01, %v593_v59 }
 0x241   :  { %v672_v30 = vpop.permute.xlu1 %671  ;;  %779 = vmatprep.subr.mxu0 %v1468_v37  ;;  %848 = vmatprep.subr.mxu1 %v700_v58 }
 0x242   :  { %v679_v52 = vsel %vm196_vm6, %v670_v62, %v672_v30  ;;  %780 = vmatpush1.msra.mxu0 %v1464_v32  ;;  %849 = vmatpush1.msra.mxu1 %v699_v29 }
 0x243   :  { %v682_v53 = vmul.f32 %v679_v52, %v1351_v2  ;;  %850 = vmatprep.subr.mxu1 %v1476_v21  ;;  %v674_v54 = vpop.permute.xlu0 %673 }
 0x244   :  { %851 = vmatpush1.msra.mxu1 %v1472_v20  ;;  %v678_v45 = vsel %vm196_vm6, %v672_v30, %v674_v54 }
 0x245   :  { %v676_v27 = vpop.permute.xlu1 %675  ;;  %781 = vmatprep.subr.mxu0 %v682_v53  ;;  %v683_v21 = vmul.f32 %v678_v45, %v1362_v9 }
 0x246   :  { %v677_v37 = vsel %vm196_vm6, %v674_v54, %v676_v27  ;;  %v680_v5 = vsel %vm196_vm6, %v676_v27, %v670_v62  ;;  %vm603_vm6 = vcmp.gt.f32.partialorder %v593_v59, 0.0  ;;  %v617_v27 = vsel %vm601_vm3, %v516_v57, %v609_v60 }
 0x247   :  { %v681_v32 = vmul.f32 %v680_v5, %v1357_v0  ;;  %v684_v2 = vmul.f32 %v677_v37, %v1365_v15  ;;  %v654_v1 = vpop.permute.xlu0 %653 }
 0x249   :  { %v656_v17 = vpop.permute.xlu1 %655  ;;  %782 = vmatpush1.msra.mxu0 %v681_v32  ;;  %852 = vmatprep.subr.mxu1 %v684_v2  ;;  %v619_v32 = vsel %vm603_vm6, %v593_v59, %v611_v61 }
 0x24a   :  { %v663_v20 = vsel %vm163_vm8, %v654_v1, %v656_v17  ;;  %853 = vmatpush1.msra.mxu1 %v683_v21 }
 0x24b   :  { %v666_v14 = vmul.f32 %v663_v20, %v1376_v25  ;;  %v658_v31 = vpop.permute.xlu0 %657 }
 0x24c   :  { %v662_v8 = vsel %vm163_vm8, %v656_v17, %v658_v31 }
 0x24d   :  { %v660_v19 = vpop.permute.xlu1 %659  ;;  %783 = vmatprep.subr.mxu0 %v666_v14  ;;  %v667_v22 = vmul.f32 %v662_v8, %v1400_v47 }
 0x24e   :  { %v661_v0 = vsel %vm163_vm8, %v658_v31, %v660_v19  ;;  %v664_v9 = vsel %vm163_vm8, %v660_v19, %v654_v1 }
 0x24f   :  { %v665_v15 = vmul.f32 %v664_v9, %v1396_v43  ;;  %v668_v16 = vmul.f32 %v661_v0, %v1403_v49  ;;  %v638_v18 = vpop.permute.xlu0 %637 }
 0x251   :  { %v640_v25 = vpop.permute.xlu1 %639  ;;  %784 = vmatpush1.msra.mxu0 %v665_v15  ;;  %854 = vmatprep.subr.mxu1 %v668_v16 }
 0x252   :  { %v647_v23 = vsel %vm130_vm7, %v638_v18, %v640_v25  ;;  %855 = vmatpush1.msra.mxu1 %v667_v22 }
 0x253   :  { %v650_v63 = vmul.f32 %v647_v23, %v1383_v33  ;;  %v642_v26 = vpop.permute.xlu0 %641 }
 0x254   :  { %v646_v28 = vsel %vm130_vm7, %v640_v25, %v642_v26 }
 0x255   :  { %v644_v42 = vpop.permute.xlu1 %643  ;;  %785 = vmatprep.subr.mxu0 %v650_v63  ;;  %v651_v3 = vmul.f32 %v646_v28, %v1391_v39 }
 0x256   :  { %v645_v43 = vsel %vm130_vm7, %v642_v26, %v644_v42  ;;  %v648_v47 = vsel %vm130_vm7, %v644_v42, %v638_v18 }
 0x257   :  { %v649_v49 = vmul.f32 %v648_v47, %v1386_v34  ;;  %v652_v48 = vmul.f32 %v645_v43, %v1406_v51  ;;  %v622_v35 = vpop.permute.xlu0 %621 }
 0x259   :  { %v624_v33 = vpop.permute.xlu1 %623  ;;  %786 = vmatpush1.msra.mxu0 %v649_v49  ;;  %856 = vmatprep.subr.mxu1 %v652_v48 }
 0x25a   :  { %v631_v36 = vsel %vm97_vm9, %v622_v35, %v624_v33  ;;  %857 = vmatpush1.msra.mxu1 %v651_v3 }
 0x25b   :  { %v634_v40 = vmul.f32 %v631_v36, %v1410_v55  ;;  %v626_v41 = vpop.permute.xlu0 %625 }
 0x25c   :  { %v630_v13 = vsel %vm97_vm9, %v624_v33, %v626_v41 }
 0x25d   :  { %v628_v44 = vpop.permute.xlu1 %627  ;;  %787 = vmatprep.subr.mxu0 %v634_v40  ;;  %v635_v55 = vmul.f32 %v630_v13, %v1440_v38 }
 0x25e   :  { %v629_v34 = vsel %vm97_vm9, %v626_v41, %v628_v44  ;;  %v632_v39 = vsel %vm97_vm9, %v628_v44, %v622_v35 }
 0x25f   :  { %v633_v51 = vmul.f32 %v632_v39, %v1430_v24  ;;  %v636_v4 = vmul.f32 %v629_v34, %v1445_v46  ;;  %v616_v46 = vsel %vm600_vm1, %v514_v56, %v608_v7 }
 0x261   :  { %788 = vmatpush1.msra.mxu0 %v633_v51  ;;  %858 = vmatprep.subr.mxu1 %v636_v4 }
 0x262   :  { %950 = vmatmul.mubr.msk.f32.vlgmr.msra.gmra.mxu0 %vm749_vm0, %v620_v50  ;;  %859 = vmatpush1.msra.mxu1 %v635_v55 }
 0x263   :  { %953 = vmatmul.mubr.msk.f32.vlgmr.msra.gmra.mxu1 %vm749_vm0, %v620_v50 }
 0x322   :  { %v823_v24 = vpop.f32.mrf.mxu0 }
 0x323   :  { %vm899_vm4 = vcmp.gt.f32.partialorder %v823_v24, 0.0  ;;  %v903_v12 = vmul.f32 0.01, %v823_v24  ;;  %v894_v38 = vpop.f32.mrf.mxu1 }
 0x324   :  { %vm901_vm5 = vcmp.gt.f32.partialorder %v894_v38, 0.0  ;;  %v905_v29 = vmul.f32 0.01, %v894_v38  ;;  %v825_v58 = vpop.f32.mrf.mxu0 }
 0x325   :  { %v907_v62 = vsel %vm899_vm4, %v823_v24, %v903_v12  ;;  %vm900_vm7 = vcmp.gt.f32.partialorder %v825_v58, 0.0  ;;  %v904_v30 = vmul.f32 0.01, %v825_v58  ;;  %v896_v52 = vpop.f32.mrf.mxu1 }
 0x326   :  { %v911_v53 = vadd.f32 %v907_v62, %v616_v46  ;;  %v909_v54 = vsel %vm901_vm5, %v894_v38, %v905_v29  ;;  %vm902_vm8 = vcmp.gt.f32.partialorder %v896_v52, 0.0  ;;  %v906_v45 = vmul.f32 0.01, %v896_v52 }
 0x327   :  { %v913_v37 = vadd.f32 %v909_v54, %v618_v6  ;;  %v908_v5 = vsel %vm900_vm7, %v825_v58, %v904_v30 }
 0x328   :  { %915 = vst [vmem:[#allocation10] sm:$0xff] %v911_v53  ;;  %v912_v2 = vadd.f32 %v908_v5, %v617_v27  ;;  %v910_v1 = vsel %vm902_vm8, %v896_v52, %v906_v45 }
 0x329   :  { %917 = vst [vmem:[#allocation10 + $0x10] sm:$0xff] %v913_v37  ;;  %v914_v21 = vadd.f32 %v910_v1, %v619_v32 }
 0x32a   :  { %916 = vst [vmem:[#allocation10 + $0x8] sm:$0xff] %v912_v2 }
 0x32b   :  { %918 = vst [vmem:[#allocation10 + $0x18] sm:$0xff] %v914_v21 }
 0x32c   :  { %1066 = shalt.err (!%p1063_p10)
}
 0x32d   :  { %928 = dma.vmem_to_hbm [thread:$0]  %s926_s18, 512, %s1648_s4, [#allocation4]  }
 0x32e   :  { %1081 = dma.done.wait [#allocation4], 512  }
 0x32f   :  { %1082 = vsyncadd [#allocation4], 4294966784 }
 0x330   :  { %932 = vsyncpa [#allocation3], 1 }
 0x331   :  { %933 = vsyncpa [#allocation6], 1 }
 0x332   :  { %934 = vsyncpa [#allocation9], 1 }
 0x333   :  { %935 = vsyncpa [#allocation4], 1 }

</bundles_post_ra>
